<compile_context>
chip_gen: v6e
topology: v6e:2x2x1
jax: 0.10.0
libtpu: 0.0.40
codegen_flags: <defaults>
</compile_context>

<pallas_src>
import functools

import jax
import jax.numpy as jnp
from jax.experimental import pallas as pl
from jax.experimental.pallas import tpu as pltpu


# --------------------------------------------------------------------------
# Small helpers
# --------------------------------------------------------------------------
def _round_up(x, m):
    return ((x + m - 1) // m) * m


def _const_index_map(ndim):
    return lambda i: (0,) * ndim


def _is_v6_or_newer():
    try:
        kind = jax.devices()[0].device_kind.lower()
    except Exception:
        return False
    return any(t in kind for t in ("v6", "v7", "tpu7"))


def _bias_relu(z_f32, b, bf16_act):
    # z_f32: f32 MXU accumulator.  bias-add + ReLU in bf16 on v6e/v7x (native
    # bf16 VPU), in f32 on v5e.  Result is bf16 (next matmul operand).
    if bf16_act:
        z = z_f32.astype(jnp.bfloat16) + b
    else:
        z = z_f32 + b
    return jnp.maximum(z, 0.0).astype(jnp.bfloat16)


# --------------------------------------------------------------------------
# Kernels
# --------------------------------------------------------------------------
def _soap_dos_fused_kernel(fc_count, bf16_act, *refs):
    """Fused branches: lanes [0, D) = DOS branch, [D, 2D) = scaling branch."""
    refs = list(refs)
    x_ref, w1_ref, b1_ref = refs[0], refs[1], refs[2]
    k = 3
    w0_ref = b0_ref = wh_ref = bh_ref = None
    if fc_count > 0:
        w0_ref, b0_ref = refs[k], refs[k + 1]
        k += 2
    if fc_count > 1:
        wh_ref, bh_ref = refs[k], refs[k + 1]
        k += 2
    wo_ref, bo_ref, out_ref = refs[k], refs[k + 1], refs[k + 2]

    # lin1 (shared by both branches); x cast to bf16 in-kernel (hidden by DMA).
    h = jnp.dot(x_ref[...].astype(jnp.bfloat16), w1_ref[...],
                preferred_element_type=jnp.float32)
    act = _bias_relu(h, b1_ref[...], bf16_act)            # (tm, D) bf16

    if fc_count > 0:
        # Layer 0: dense (D, W) weight [w_dos[0] | w_sc[0]] -> no concat,
        # no zero-block MACs.
        z = jnp.dot(act, w0_ref[...], preferred_element_type=jnp.float32)
        act = _bias_relu(z, b0_ref[...], bf16_act)        # (tm, W) bf16
    for i in range(max(fc_count - 1, 0)):
        # Layers >= 1: block-diagonal (W, W) weight (dos half | scaling half).
        z = jnp.dot(act, wh_ref[i], preferred_element_type=jnp.float32)
        act = _bias_relu(z, bh_ref[i], bf16_act)

    # Packed output head: DOS -> lanes [0, O), scaling -> lane O, rest zero.
    out = jnp.dot(act, wo_ref[...], preferred_element_type=jnp.float32)
    out = out + bo_ref[...]
    out_ref[...] = out.astype(out_ref.dtype)              # one dense bf16 store


def _soap_dos_unfused_kernel(fc_count, bf16_act, *refs):
    """Unfused two-branch layout for large hidden widths (no 2x MXU waste)."""
    (x_ref, w1_ref, b1_ref, wd_ref, bd_ref, ws_ref, bs_ref,
     wod_ref, wos_ref, bo_ref, out_ref) = refs

    h = jnp.dot(x_ref[...].astype(jnp.bfloat16), w1_ref[...],
                preferred_element_type=jnp.float32)
    h = _bias_relu(h, b1_ref[...], bf16_act)              # (tm, D) bf16

    dos = h
    for i in range(fc_count):
        z = jnp.dot(dos, wd_ref[i], preferred_element_type=jnp.float32)
        dos = _bias_relu(z, bd_ref[i], bf16_act)
    sc = h
    for i in range(fc_count):
        z = jnp.dot(sc, ws_ref[i], preferred_element_type=jnp.float32)
        sc = _bias_relu(z, bs_ref[i], bf16_act)

    out = (jnp.dot(dos, wod_ref[...], preferred_element_type=jnp.float32)
           + jnp.dot(sc, wos_ref[...], preferred_element_type=jnp.float32)
           + bo_ref[...])
    out_ref[...] = out.astype(out_ref.dtype)


# --------------------------------------------------------------------------
# Weight packing (done once, outside the kernel)
# --------------------------------------------------------------------------
def _pack_fused(p, fc_count, out_pad, bias_dt):
    D = p["w1"].shape[1]
    O = p["w_out_dos"].shape[1]
    W = max(2 * D, 128)                     # lane-dense fused hidden width
    bf16, f32 = jnp.bfloat16, jnp.float32

    packed = [p["w1"].astype(bf16), p["b1"].astype(bias_dt)]

    if fc_count > 0:
        w0 = jnp.zeros((D, W), f32)
        w0 = w0.at[:, :D].set(p["w_dos"][0]).at[:, D:2 * D].set(p["w_sc"][0])
        b0 = jnp.zeros((1, W), f32)
        b0 = b0.at[:, :D].set(p["b_dos"][0]).at[:, D:2 * D].set(p["b_sc"][0])
        packed += [w0.astype(bf16), b0.astype(bias_dt)]
        if fc_count > 1:
            whs, bhs = [], []
            for i in range(1, fc_count):
                w = jnp.zeros((W, W), f32)
                w = (w.at[:D, :D].set(p["w_dos"][i])
                      .at[D:2 * D, D:2 * D].set(p["w_sc"][i]))
                b = jnp.zeros((1, W), f32)
                b = b.at[:, :D].set(p["b_dos"][i]).at[:, D:2 * D].set(p["b_sc"][i])
                whs.append(w)
                bhs.append(b)
            packed += [jnp.stack(whs).astype(bf16), jnp.stack(bhs).astype(bias_dt)]
        wo_rows = W
    else:
        wo_rows = D

    wo = jnp.zeros((wo_rows, out_pad), f32)
    wo = wo.at[:D, :O].set(p["w_out_dos"])
    if fc_count > 0:
        wo = wo.at[D:2 * D, O:O + 1].set(p["w_out_sc"])
    else:
        wo = wo.at[:D, O:O + 1].set(p["w_out_sc"])
    bo = jnp.zeros((1, out_pad), f32)
    bo = bo.at[:, :O].set(p["b_out_dos"]).at[:, O:O + 1].set(p["b_out_sc"])
    packed += [wo.astype(bf16), bo.astype(f32)]           # bo stays f32 (f32 acc)
    return packed, W


def _pack_unfused(p, fc_count, out_pad, bias_dt):
    D = p["w1"].shape[1]
    O = p["w_out_dos"].shape[1]
    bf16, f32 = jnp.bfloat16, jnp.float32
    packed = [p["w1"].astype(bf16), p["b1"].astype(bias_dt),
              p["w_dos"].astype(bf16), p["b_dos"].astype(bias_dt),
              p["w_sc"].astype(bf16), p["b_sc"].astype(bias_dt)]
    wod = jnp.zeros((D, out_pad), f32).at[:, :O].set(p["w_out_dos"])
    wos = jnp.zeros((D, out_pad), f32).at[:, O:O + 1].set(p["w_out_sc"])
    bo = (jnp.zeros((1, out_pad), f32)
          .at[:, :O].set(p["b_out_dos"]).at[:, O:O + 1].set(p["b_out_sc"]))
    packed += [wod.astype(bf16), wos.astype(bf16), bo]
    return packed, D


# --------------------------------------------------------------------------
# Wrapper
# --------------------------------------------------------------------------
def _choose_tm(n_rows, tm_request):
    tm = min(tm_request, _round_up(n_rows, 128))
    tm = max(128, (tm // 128) * 128)
    # Megacore balance (v7x has 2 TCs): keep >= 2 row blocks when there is
    # enough work to split.
    if n_rows > 256 and pl.cdiv(n_rows, tm) < 2:
        tm = max(128, _round_up(pl.cdiv(n_rows, 2), 128))
    return tm


def soap_dos_forward(x, params, *, fc_count, tm=1024,
                     force_fused=None, force_bf16_act=None):
    """Pallas forward pass of SOAP_DOS.

    x: [N, F] float32 SOAP features.
    Returns (dos_out [N, O] or [N], scaling [N]) matching the PyTorch module.
    """
    N, F = x.shape
    D = params["w1"].shape[1]
    O = params["w_out_dos"].shape[1]
    out_pad = max(128, _round_up(O + 1, 128))

    v6_plus = _is_v6_or_newer()
    bf16_act = v6_plus if force_bf16_act is None else bool(force_bf16_act)
    mxu_tile = 256 if v6_plus else 128
    if fc_count == 0:
        fused = True                        # no block-diag layers exist anyway
    elif force_fused is not None:
        fused = bool(force_fused)
    else:
        fused = (2 * D) <= mxu_tile         # zero blocks ride free inside 1 MXU tile

    bias_dt = jnp.bfloat16 if bf16_act else jnp.float32
    if fused:
        weights, width = _pack_fused(params, fc_count, out_pad, bias_dt)
        kernel = functools.partial(_soap_dos_fused_kernel, fc_count, bf16_act)
    else:
        weights, width = _pack_unfused(params, fc_count, out_pad, bias_dt)
        kernel = functools.partial(_soap_dos_unfused_kernel, fc_count, bf16_act)

    tm = _choose_tm(N, tm)
    grid = (pl.cdiv(N, tm),)                # partial last block handled by Pallas

    x = x.astype(jnp.float32)               # no wrapper-side bf16 cast / padding

    # Weights are VMEM-resident across the row grid (constant index maps).
    # TODO(synk): pipeline_mode=pl.Buffered(1) would single-buffer them and
    # halve their VMEM footprint; left off for lowering portability.
    in_specs = [pl.BlockSpec((tm, F), lambda i: (i, 0))]
    in_specs += [pl.BlockSpec(w.shape, _const_index_map(w.ndim)) for w in weights]
    out_spec = pl.BlockSpec((tm, out_pad), lambda i: (i, 0))

    # VMEM budget from the actual footprint, capped v7x-safe (<= 48 MiB).
    weight_bytes = sum(int(w.size) * w.dtype.itemsize for w in weights)
    est = (2 * tm * F * 4                        # double-buffered f32 x tile
           + 2 * tm * out_pad * 2                # double-buffered bf16 out tile
           + 2 * weight_bytes                    # resident weights
           + 6 * tm * max(width, F, out_pad) * 4 # activation slabs / scratch
           + (4 << 20))                          # slack
    vmem_limit = int(min(max(est, 16 << 20), 48 << 20))

    out = pl.pallas_call(
        kernel,
        out_shape=jax.ShapeDtypeStruct((N, out_pad), jnp.bfloat16),
        grid_spec=pltpu.PrefetchScalarGridSpec(
            num_scalar_prefetch=0,
            grid=grid,
            in_specs=in_specs,
            out_specs=out_spec),
        compiler_params=pltpu.CompilerParams(
            dimension_semantics=("parallel",),
            vmem_limit_bytes=vmem_limit),
    )(x, *weights)

    dos = out[:, :O].astype(jnp.float32)
    scaling = out[:, O].astype(jnp.float32)
    if O == 1:
        return dos.reshape(-1), scaling
    return dos, scaling


# --------------------------------------------------------------------------
# Synthetic params + pure-JAX reference (f32, matches the PyTorch forward)
# --------------------------------------------------------------------------
def init_params(key, in_features, dim1, output_dim, fc_count):
    ks = jax.random.split(key, 10)
    n01 = lambda k, shape, scale: (scale * jax.random.normal(k, shape)
                                   ).astype(jnp.float32)
    return {
        "w1": n01(ks[0], (in_features, dim1), 0.05),
        "b1": n01(ks[1], (1, dim1), 0.05),
        "w_dos": n01(ks[2], (fc_count, dim1, dim1), 0.05),
        "b_dos": n01(ks[3], (fc_count, 1, dim1), 0.05),
        "w_out_dos": n01(ks[4], (dim1, output_dim), 0.05),
        "b_out_dos": n01(ks[5], (1, output_dim), 0.05),
        "w_sc": n01(ks[6], (fc_count, dim1, dim1), 0.05),
        "b_sc": n01(ks[7], (fc_count, 1, dim1), 0.05),
        "w_out_sc": n01(ks[8], (dim1, 1), 0.05),
        "b_out_sc": n01(ks[9], (1, 1), 0.05),
    }


def soap_dos_reference(x, params, *, fc_count):
    h = jnp.maximum(x @ params["w1"] + params["b1"], 0.0)
    dos = h
    for i in range(fc_count):
        dos = jnp.maximum(dos @ params["w_dos"][i] + params["b_dos"][i], 0.0)
    dos = dos @ params["w_out_dos"] + params["b_out_dos"]
    sc = h
    for i in range(fc_count):
        sc = jnp.maximum(sc @ params["w_sc"][i] + params["b_sc"][i], 0.0)
    sc = sc @ params["w_out_sc"] + params["b_out_sc"]
    if dos.shape[1] == 1:
        return dos.reshape(-1), sc.reshape(-1)
    return dos, sc.reshape(-1)


# --------------------------------------------------------------------------
# Demo / self-test
# --------------------------------------------------------------------------
if __name__ == "__main__":
    key = jax.random.PRNGKey(0)

    def run_case(case_id, N, F, D, O, FC, tol, **kw):
        kx, kp = jax.random.split(jax.random.fold_in(key, case_id))
        x = jax.random.normal(kx, (N, F), dtype=jnp.float32)
        params = init_params(kp, F, D, O, FC)
        dos, sc = soap_dos_forward(x, params, fc_count=FC, **kw)
        jax.block_until_ready((dos, sc))
        dos_ref, sc_ref = soap_dos_reference(x, params, fc_count=FC)
        assert dos.shape == dos_ref.shape, f"case {case_id}: dos shape"
        assert sc.shape == (N,), f"case {case_id}: scaling shape"
        # bf16 matmul operands / bf16 output store, f32 accumulation.
        assert jnp.allclose(dos, dos_ref, atol=tol, rtol=tol), \
            f"case {case_id}: dos mismatch"
        assert jnp.allclose(sc, sc_ref, atol=tol, rtol=tol), \
            f"case {case_id}: scaling mismatch"

    # 1) Typical small SOAP_DOS sizes -> fused block-diagonal path.
    run_case(0, N=16, F=64, D=32, O=16, FC=2, tol=2.5e-2)
    # 2) Single hidden layer (distinct fused kernel signature, no wh stack).
    run_case(1, N=20, F=32, D=64, O=8, FC=1, tol=2.5e-2)
    # 3) Large hidden width -> unfused two-branch path, partial row blocks.
    run_case(2, N=300, F=200, D=256, O=40, FC=2, tol=5e-2, force_fused=False)
    # 4) fc_count=0 and scalar DOS output (exercises the .view(-1) path).
    run_case(3, N=10, F=48, D=32, O=1, FC=0, tol=2.5e-2)

    print("KERNEL_OK")
</pallas_src>

<mosaic_0001>
module attributes {stable_mosaic.version = 11 : i64} {
  func.func @_soap_dos_fused_kernel(%arg0: i32, %arg1: memref<128x64xf32, #tpu.memory_space<vmem>>, %arg2: memref<64x32xbf16, #tpu.memory_space<vmem>>, %arg3: memref<1x32xf32, #tpu.memory_space<vmem>>, %arg4: memref<32x128xbf16, #tpu.memory_space<vmem>>, %arg5: memref<1x128xf32, #tpu.memory_space<vmem>>, %arg6: memref<1x128x128xbf16, #tpu.memory_space<vmem>>, %arg7: memref<1x1x128xf32, #tpu.memory_space<vmem>>, %arg8: memref<128x128xbf16, #tpu.memory_space<vmem>>, %arg9: memref<1x128xf32, #tpu.memory_space<vmem>>, %arg10: memref<128x128xbf16, #tpu.memory_space<vmem>>) attributes {dimension_semantics = [#tpu.dimension_semantics<parallel>], iteration_bounds = array<i64: 1>, scalar_prefetch = 0 : i64, scratch_operands = 0 : i64, tpu.core_type = #tpu.core_type<tc>, window_params = [{transform_indices = @transform_0, window_bounds = array<i64: 128, 64>}, {pipeline_mode = #tpu.pipeline_mode<synchronous>, transform_indices = @transform_1, window_bounds = array<i64: 64, 32>}, {pipeline_mode = #tpu.pipeline_mode<synchronous>, transform_indices = @transform_2, window_bounds = array<i64: 1, 32>}, {pipeline_mode = #tpu.pipeline_mode<synchronous>, transform_indices = @transform_3, window_bounds = array<i64: 32, 128>}, {pipeline_mode = #tpu.pipeline_mode<synchronous>, transform_indices = @transform_4, window_bounds = array<i64: 1, 128>}, {pipeline_mode = #tpu.pipeline_mode<synchronous>, transform_indices = @transform_5, window_bounds = array<i64: 1, 128, 128>}, {pipeline_mode = #tpu.pipeline_mode<synchronous>, transform_indices = @transform_6, window_bounds = array<i64: 1, 1, 128>}, {pipeline_mode = #tpu.pipeline_mode<synchronous>, transform_indices = @transform_7, window_bounds = array<i64: 128, 128>}, {pipeline_mode = #tpu.pipeline_mode<synchronous>, transform_indices = @transform_8, window_bounds = array<i64: 1, 128>}, {transform_indices = @transform_9, window_bounds = array<i64: 128, 128>}]} {
    %c0 = arith.constant 0 : index
    %c0_0 = arith.constant 0 : index
    %0 = vector.load %arg1[%c0, %c0_0] : memref<128x64xf32, #tpu.memory_space<vmem>>, vector<128x64xf32>
    %1 = arith.truncf %0 : vector<128x64xf32> to vector<128x64xbf16>
    %c0_1 = arith.constant 0 : index
    %c0_2 = arith.constant 0 : index
    %2 = vector.load %arg2[%c0_1, %c0_2] : memref<64x32xbf16, #tpu.memory_space<vmem>>, vector<64x32xbf16>
    %cst = arith.constant dense<0.000000e+00> : vector<128x32xf32>
    %3 = tpu.matmul %1, %2, %cst {dimension_numbers = #tpu.dot_dimension_numbers<[1], [0], [0], [1], [0, 0, 1, 1], [], []>} : vector<128x64xbf16>, vector<64x32xbf16>, vector<128x32xf32> -> vector<128x32xf32>
    %c0_3 = arith.constant 0 : index
    %c0_4 = arith.constant 0 : index
    %4 = vector.load %arg3[%c0_3, %c0_4] : memref<1x32xf32, #tpu.memory_space<vmem>>, vector<1x32xf32>
    %5 = vector.broadcast %4 : vector<1x32xf32> to vector<128x32xf32>
    %6 = arith.addf %3, %5 : vector<128x32xf32>
    %cst_5 = arith.constant 0.000000e+00 : f32
    %7 = vector.broadcast %cst_5 : f32 to vector<128x32xf32>
    %8 = arith.maximumf %6, %7 : vector<128x32xf32>
    %9 = arith.truncf %8 : vector<128x32xf32> to vector<128x32xbf16>
    %c0_6 = arith.constant 0 : index
    %c0_7 = arith.constant 0 : index
    %10 = vector.load %arg4[%c0_6, %c0_7] : memref<32x128xbf16, #tpu.memory_space<vmem>>, vector<32x128xbf16>
    %cst_8 = arith.constant dense<0.000000e+00> : vector<128x128xf32>
    %11 = tpu.matmul %9, %10, %cst_8 {dimension_numbers = #tpu.dot_dimension_numbers<[1], [0], [0], [1], [0, 0, 1, 1], [], []>} : vector<128x32xbf16>, vector<32x128xbf16>, vector<128x128xf32> -> vector<128x128xf32>
    %c0_9 = arith.constant 0 : index
    %c0_10 = arith.constant 0 : index
    %12 = vector.load %arg5[%c0_9, %c0_10] : memref<1x128xf32, #tpu.memory_space<vmem>>, vector<1x128xf32>
    %13 = vector.broadcast %12 : vector<1x128xf32> to vector<128x128xf32>
    %14 = arith.addf %11, %13 : vector<128x128xf32>
    %cst_11 = arith.constant 0.000000e+00 : f32
    %15 = vector.broadcast %cst_11 : f32 to vector<128x128xf32>
    %16 = arith.maximumf %14, %15 : vector<128x128xf32>
    %17 = arith.truncf %16 : vector<128x128xf32> to vector<128x128xbf16>
    %c0_12 = arith.constant 0 : index
    %c0_13 = arith.constant 0 : index
    %c0_14 = arith.constant 0 : index
    %18 = vector.load %arg6[%c0_12, %c0_13, %c0_14] : memref<1x128x128xbf16, #tpu.memory_space<vmem>>, vector<1x128x128xbf16>
    %19 = vector.shape_cast %18 : vector<1x128x128xbf16> to vector<128x128xbf16>
    %cst_15 = arith.constant dense<0.000000e+00> : vector<128x128xf32>
    %20 = tpu.matmul %17, %19, %cst_15 {dimension_numbers = #tpu.dot_dimension_numbers<[1], [0], [0], [1], [0, 0, 1, 1], [], []>} : vector<128x128xbf16>, vector<128x128xbf16>, vector<128x128xf32> -> vector<128x128xf32>
    %c0_16 = arith.constant 0 : index
    %c0_17 = arith.constant 0 : index
    %c0_18 = arith.constant 0 : index
    %21 = vector.load %arg7[%c0_16, %c0_17, %c0_18] : memref<1x1x128xf32, #tpu.memory_space<vmem>>, vector<1x1x128xf32>
    %22 = vector.shape_cast %21 : vector<1x1x128xf32> to vector<1x128xf32>
    %23 = vector.broadcast %22 : vector<1x128xf32> to vector<128x128xf32>
    %24 = arith.addf %20, %23 : vector<128x128xf32>
    %cst_19 = arith.constant 0.000000e+00 : f32
    %25 = vector.broadcast %cst_19 : f32 to vector<128x128xf32>
    %26 = arith.maximumf %24, %25 : vector<128x128xf32>
    %27 = arith.truncf %26 : vector<128x128xf32> to vector<128x128xbf16>
    %c0_20 = arith.constant 0 : index
    %c0_21 = arith.constant 0 : index
    %28 = vector.load %arg8[%c0_20, %c0_21] : memref<128x128xbf16, #tpu.memory_space<vmem>>, vector<128x128xbf16>
    %cst_22 = arith.constant dense<0.000000e+00> : vector<128x128xf32>
    %29 = tpu.matmul %27, %28, %cst_22 {dimension_numbers = #tpu.dot_dimension_numbers<[1], [0], [0], [1], [0, 0, 1, 1], [], []>} : vector<128x128xbf16>, vector<128x128xbf16>, vector<128x128xf32> -> vector<128x128xf32>
    %c0_23 = arith.constant 0 : index
    %c0_24 = arith.constant 0 : index
    %30 = vector.load %arg9[%c0_23, %c0_24] : memref<1x128xf32, #tpu.memory_space<vmem>>, vector<1x128xf32>
    %31 = vector.broadcast %30 : vector<1x128xf32> to vector<128x128xf32>
    %32 = arith.addf %29, %31 : vector<128x128xf32>
    %33 = arith.truncf %32 : vector<128x128xf32> to vector<128x128xbf16>
    %c0_25 = arith.constant 0 : index
    %c0_26 = arith.constant 0 : index
    %34 = vector.load %arg10[%c0_25, %c0_26] : memref<128x128xbf16, #tpu.memory_space<vmem>>, vector<128x128xbf16>
    tpu.vector_store %arg10[%c0_25, %c0_26], %33 {strides = array<i32>} : memref<128x128xbf16, #tpu.memory_space<vmem>>, vector<128x128xbf16>,
    return
  }
  func.func @transform_0(%arg0: i32) -> (i32, i32) {
    %c0_i32 = arith.constant 0 : i32
    %c0_i32_0 = arith.constant 0 : i32
    return %arg0, %c0_i32 : i32, i32
  }
  func.func @transform_1(%arg0: i32) -> (i32, i32) {
    %c0_i32 = arith.constant 0 : i32
    %c0_i32_0 = arith.constant 0 : i32
    %c0_i32_1 = arith.constant 0 : i32
    return %c0_i32, %c0_i32_0 : i32, i32
  }
  func.func @transform_2(%arg0: i32) -> (i32, i32) {
    %c0_i32 = arith.constant 0 : i32
    %c0_i32_0 = arith.constant 0 : i32
    %c0_i32_1 = arith.constant 0 : i32
    return %c0_i32, %c0_i32_0 : i32, i32
  }
  func.func @transform_3(%arg0: i32) -> (i32, i32) {
    %c0_i32 = arith.constant 0 : i32
    %c0_i32_0 = arith.constant 0 : i32
    %c0_i32_1 = arith.constant 0 : i32
    return %c0_i32, %c0_i32_0 : i32, i32
  }
  func.func @transform_4(%arg0: i32) -> (i32, i32) {
    %c0_i32 = arith.constant 0 : i32
    %c0_i32_0 = arith.constant 0 : i32
    %c0_i32_1 = arith.constant 0 : i32
    return %c0_i32, %c0_i32_0 : i32, i32
  }
  func.func @transform_5(%arg0: i32) -> (i32, i32, i32) {
    %c0_i32 = arith.constant 0 : i32
    %c0_i32_0 = arith.constant 0 : i32
    %c0_i32_1 = arith.constant 0 : i32
    %c0_i32_2 = arith.constant 0 : i32
    return %c0_i32, %c0_i32_0, %c0_i32_1 : i32, i32, i32
  }
  func.func @transform_6(%arg0: i32) -> (i32, i32, i32) {
    %c0_i32 = arith.constant 0 : i32
    %c0_i32_0 = arith.constant 0 : i32
    %c0_i32_1 = arith.constant 0 : i32
    %c0_i32_2 = arith.constant 0 : i32
    return %c0_i32, %c0_i32_0, %c0_i32_1 : i32, i32, i32
  }
  func.func @transform_7(%arg0: i32) -> (i32, i32) {
    %c0_i32 = arith.constant 0 : i32
    %c0_i32_0 = arith.constant 0 : i32
    %c0_i32_1 = arith.constant 0 : i32
    return %c0_i32, %c0_i32_0 : i32, i32
  }
  func.func @transform_8(%arg0: i32) -> (i32, i32) {
    %c0_i32 = arith.constant 0 : i32
    %c0_i32_0 = arith.constant 0 : i32
    %c0_i32_1 = arith.constant 0 : i32
    return %c0_i32, %c0_i32_0 : i32, i32
  }
  func.func @transform_9(%arg0: i32) -> (i32, i32) {
    %c0_i32 = arith.constant 0 : i32
    %c0_i32_0 = arith.constant 0 : i32
    return %arg0, %c0_i32 : i32, i32
  }
}

</mosaic_0001>

<bundles_post_ra>
// kernel: tpu_custom_call.1
= control target key start
LH: loop header
LB: loop body
LE: loop exit
PB: predicated region body
PF: predicated region fallthrough
CT: control target
= control target key end

     0   :  { %14 = vsyncpa [#allocation3], 0  ;;  %s1459_s0 = inlined_call_operand.vmem [shape: f32[16,64], index: 0, kind: input, shape index: {}]   ;;  %s1460_s1 = inlined_call_operand.vmem [shape: bf16[64,32], index: 1, kind: input, shape index: {}]   ;;  %s1461_s2 = inlined_call_operand.vmem [shape: f32[1,32], index: 2, kind: input, shape index: {}]   ;;  %s1462_s3 = inlined_call_operand.vmem [shape: bf16[32,128], index: 3, kind: input, shape index: {}]   ;;  %s1463_s4 = inlined_call_operand.vmem [shape: f32[1,128], index: 4, kind: input, shape index: {}]   ;;  %s1464_s5 = inlined_call_operand.hbm [shape: bf16[1,128,128], index: 5, kind: input, shape index: {}]   ;;  %s1465_s6 = inlined_call_operand.vmem [shape: f32[1,1,128], index: 6, kind: input, shape index: {}]   ;;  %s1466_s7 = inlined_call_operand.hbm [shape: bf16[128,128], index: 7, kind: input, shape index: {}]   ;;  %s1467_s8 = inlined_call_operand.vmem [shape: f32[1,128], index: 8, kind: input, shape index: {}]   ;;  %s1468_s9 = inlined_call_operand.hbm [shape: bf16[16,128], index: 9, kind: output, shape index: {}]  }
   0x1   :  { %15 = vsyncpa [#allocation6], 0 }
   0x2   :  { %16 = vsyncpa [#allocation4], 0  ;;  %s1274_s30 = smov [#allocation2]  }
   0x3   :  { %s32_s10 = sshll.u32 %s1274_s30, 4  ;;  %s33_s10 = int_to_ptr.vmem [resolvable:$true] %s32_s10 }
   0x4   :  { %s1216_s11 = scalar_lea.vmem %s33_s10, 1024  ;;  %p1221_p1 = scmp.lt.s32.totalorder %s33_s10, %s33_s10 }
   0x5   :  { %p1217_p0 = scmp.ne.s32.totalorder %s33_s10, %s1216_s11  ;;  %p1222_p2 = scmp.lt.s32.totalorder %s1216_s11, %s1216_s11 }
   0x7   :  { %p1223_p3 = por %p1222_p2, %p1221_p1 }
   0x9   :  { %p1224_p4 = pnand %p1223_p3, %p1217_p0 }
   0xb   :  { %1227 = shalt.err (!%p1224_p4)
}
   0xc   :  { %s1275_s12 = smov 64   ;;  %s1276_s13 = smov 4  }
   0xd   :  { %38 = dma.hbm_to_vmem [thread:$0]  %s1464_s5, 1024, %s33_s10, [#allocation3], %s1275_s12, %s1275_s12, %s1276_s13  }
   0xe   :  { %s1277_s16 = smov [#allocation5]  }
   0xf   :  { %s46_s17 = sshll.u32 %s1277_s16, 4  ;;  %s47_s17 = int_to_ptr.vmem [resolvable:$true] %s46_s17 }
  0x10   :  { %s1236_s18 = scalar_lea.vmem %s47_s17, 1024  ;;  %p1241_p6 = scmp.lt.s32.totalorder %s47_s17, %s47_s17 }
  0x11   :  { %p1237_p5 = scmp.ne.s32.totalorder %s47_s17, %s1236_s18  ;;  %p1242_p7 = scmp.lt.s32.totalorder %s1236_s18, %s1236_s18 }
  0x13   :  { %p1243_p8 = por %p1242_p7, %p1241_p6 }
  0x15   :  { %p1244_p9 = pnand %p1243_p8, %p1237_p5 }
  0x17   :  { %1247 = shalt.err (!%p1244_p9)
}
  0x18   :  { %52 = dma.hbm_to_vmem [thread:$0]  %s1466_s7, 1024, %s47_s17, [#allocation6], %s1275_s12, %s1275_s12, %s1276_s13  }
  0x19   :  { %1268 = dma.done.wait [#allocation3], 1024  }
  0x1a   :  { %1269 = vsyncadd [#allocation3], 4294966272 }
  0x1b   :  { %1270 = dma.done.wait [#allocation6], 1024  }
  0x1c   :  { %1271 = vsyncadd [#allocation6], 4294966272  ;;  %v1186_v0 = vld [vmem:[%s1460_s1 + $0x18] sm:$0xff]   ;;  %v1187_v1 = vld [vmem:[%s1460_s1 + $0x10] sm:$0xff]   ;;  %vm125_vm0 = vcmask 523264   ;;  %vm294_vm1 = vcmask 261120  }
  0x1d   :  { %1073 = vmatprep.subr.bf16.mxu0 %v1186_v0  ;;  %v1188_v2 = vld [vmem:[%s1460_s1 + $0x8] sm:$0xff]   ;;  %v62_v3 = vld [vmem:[%s1459_s0] sm:$0xff]  ;;  %v64_v7 = vld [vmem:[%s1459_s0 + $0x10] sm:$0xff] }
  0x1e   :  { %1074 = vmatpush3.bf16.msra.mxu0 %v1186_v0  ;;  %v63_v4 = vld [vmem:[%s1459_s0 + $0x8] sm:$0xff]  ;;  %v1189_v6 = vld [vmem:[%s1460_s1] sm:$0xff]   ;;  %v65_v8 = vld [vmem:[%s1459_s0 + $0x18] sm:$0xff] }
  0x1f   :  { %1075 = vmatprep.subr.bf16.mxu0 %v1187_v1  ;;  %v78_v5 = vpack.c.bf16 %v63_v4, %v62_v3  ;;  %v66_v9 = vld [vmem:[%s1459_s0 + $0x20] sm:$0xff]  ;;  %v67_v10 = vld [vmem:[%s1459_s0 + $0x28] sm:$0xff]  ;;  %v79_v11 = vpack.c.bf16 %v65_v8, %v64_v7  ;;  %v68_v13 = vld [vmem:[%s1459_s0 + $0x30] sm:$0xff] }
  0x20   :  { %v80_v12 = vpack.c.bf16 %v67_v10, %v66_v9  ;;  %v69_v14 = vld [vmem:[%s1459_s0 + $0x38] sm:$0xff]  ;;  %v70_v15 = vld [vmem:[%s1459_s0 + $0x40] sm:$0xff]  ;;  %v71_v16 = vld [vmem:[%s1459_s0 + $0x48] sm:$0xff] }
  0x21   :  { %1081 = vmatprep.mubr.msk.bf16.mxu0 %vm125_vm0, %v78_v5  ;;  %v81_v17 = vpack.c.bf16 %v69_v14, %v68_v13  ;;  %v82_v18 = vpack.c.bf16 %v71_v16, %v70_v15  ;;  %v72_v19 = vld [vmem:[%s1459_s0 + $0x50] sm:$0xff]  ;;  %v73_v20 = vld [vmem:[%s1459_s0 + $0x58] sm:$0xff]  ;;  %v74_v21 = vld [vmem:[%s1459_s0 + $0x60] sm:$0xff] }
  0x22   :  { %1076 = vmatpush3.bf16.msra.mxu0 %v1187_v1  ;;  %v75_v22 = vld [vmem:[%s1459_s0 + $0x68] sm:$0xff]  ;;  %v83_v23 = vpack.c.bf16 %v73_v20, %v72_v19  ;;  %v76_v25 = vld [vmem:[%s1459_s0 + $0x70] sm:$0xff]  ;;  %v77_v26 = vld [vmem:[%s1459_s0 + $0x78] sm:$0xff] }
  0x23   :  { %1077 = vmatprep.subr.bf16.mxu0 %v1188_v2  ;;  %v84_v24 = vpack.c.bf16 %v75_v22, %v74_v21  ;;  %v85_v27 = vpack.c.bf16 %v77_v26, %v76_v25  ;;  %v1190_v28 = vld [vmem:[%s1462_s3 + $0x8] sm:$0xff]   ;;  %v1191_v29 = vld [vmem:[%s1462_s3] sm:$0xff]   ;;  %v1192_v30 = vld [vmem:[#allocation2 + $0x38] sm:$0xff]  }
  0x24   :  { %1097 = vmatprep.subr.bf16.mxu1 %v1190_v28  ;;  %v1418_v33 = vld [vmem:[%s1461_s2] ss:$0 sm:$0xff]  ;;  %v1193_v49 = vld [vmem:[#allocation2 + $0x30] sm:$0xff]   ;;  %v1194_v57 = vld [vmem:[#allocation2 + $0x28] sm:$0xff]  }
  0x25   :  { %1098 = vmatpush3.bf16.msra.mxu1 %v1190_v28  ;;  %v1195_v1 = vld [vmem:[#allocation2 + $0x20] sm:$0xff]   ;;  %v1196_v9 = vld [vmem:[#allocation2 + $0x18] sm:$0xff]   ;;  %v1197_v28 = vld [vmem:[#allocation2 + $0x10] sm:$0xff]  }
  0x26   :  { %1078 = vmatpush3.bf16.msra.mxu0 %v1188_v2  ;;  %1099 = vmatprep.subr.bf16.mxu1 %v1191_v29 }
  0x27   :  { %1079 = vmatprep.subr.bf16.mxu0 %v1189_v6 }
  0x29   :  { %1100 = vmatpush3.bf16.msra.mxu1 %v1191_v29  ;;  %v1198_v29 = vld [vmem:[#allocation2 + $0x8] sm:$0xff]  }
  0x2a   :  { %1080 = vmatpush3.bf16.msra.mxu0 %v1189_v6  ;;  %1117 = vmatprep.subr.bf16.mxu1 %v1192_v30 }
  0x2d   :  { %1082 = vmatmul.mubr.msk.bf16.vlgmr.msra.gmra.mxu0 %vm125_vm0, %v79_v11 }
  0x2e   :  { %1085 = vmatprep.mubr.msk.bf16.mxu0 %vm125_vm0, %v80_v12 }
  0x35   :  { %1086 = vmatmul.mubr.msk.bf16.gmra.mxu0 %vm125_vm0, %v81_v17 }
  0x36   :  { %1089 = vmatprep.mubr.msk.bf16.mxu0 %vm125_vm0, %v82_v18 }
  0x3d   :  { %1090 = vmatmul.mubr.msk.bf16.gmra.mxu0 %vm125_vm0, %v83_v23 }
  0x3e   :  { %1093 = vmatprep.mubr.msk.bf16.mxu0 %vm125_vm0, %v84_v24 }
  0x45   :  { %1094 = vmatmul.mubr.msk.bf16.gmra.mxu0 %vm125_vm0, %v85_v27 }
  0xed   :  { %v1083_v31 = vpop.f32.mrf.mxu0 }
  0xee   :  { %v193_v37 = vadd.f32 %v1083_v31, %v1418_v33  ;;  %v1200_v31 = vld [vmem:[#allocation5 + $0x38] sm:$0xff]  }
  0xef   :  { %v184_v32 = vpop.f32.mrf.mxu0  ;;  %1149 = vmatprep.subr.bf16.mxu0 %v1200_v31 }
  0xf0   :  { %v185_v35 = vadd.f32 %v1418_v33, %v184_v32  ;;  %v249_v44 = vmax.f32 %v193_v37, 0.0  ;;  %v1201_v32 = vld [vmem:[#allocation5 + $0x30] sm:$0xff]   ;;  %1150 = vmatpush3.bf16.msra.mxu0 %v1200_v31  ;;  %v1207_v31 = vld [vmem:[#allocation5] sm:$0xff]  }
  0xf1   :  { %v1084_v34 = vpop.f32.mrf.mxu0  ;;  %1151 = vmatprep.subr.bf16.mxu0 %v1201_v32 }
  0xf2   :  { %v196_v36 = vadd.f32 %v1084_v34, %v1418_v33  ;;  %v247_v42 = vmax.f32 %v185_v35, 0.0  ;;  %v1203_v34 = vld [vmem:[#allocation5 + $0x20] sm:$0xff]   ;;  %v1204_v35 = vld [vmem:[#allocation5 + $0x18] sm:$0xff]  }
  0xf3   :  { %v187_v38 = vpop.f32.mrf.mxu0 }
  0xf4   :  { %v188_v39 = vadd.f32 %v1418_v33, %v187_v38  ;;  %v250_v40 = vmax.f32 %v196_v36, 0.0  ;;  %1152 = vmatpush3.bf16.msra.mxu0 %v1201_v32  ;;  %v911_v38 = vld [vmem:[%s1463_s4] ss:$0 sm:$0xff] }
  0xf5   :  { %v1087_v41 = vpop.f32.mrf.mxu0 }
  0xf6   :  { %v248_v43 = vmax.f32 %v188_v39, 0.0  ;;  %v264_v47 = vpack.c.bf16 %v250_v40, %v249_v44  ;;  %v209_v52 = vadd.f32 %v1087_v41, %v1418_v33 }
  0xf7   :  { %v200_v45 = vpop.f32.mrf.mxu0 }
  0xf8   :  { %v263_v46 = vpack.c.bf16 %v248_v43, %v247_v42  ;;  %v201_v50 = vadd.f32 %v1418_v33, %v200_v45  ;;  %v253_v60 = vmax.f32 %v209_v52, 0.0 }
  0xf9   :  { %v1088_v48 = vpop.f32.mrf.mxu0 }
  0xfa   :  { %v212_v51 = vadd.f32 %v1088_v48, %v1418_v33  ;;  %1101 = vmatprep.mubr.msk.bf16.mxu1 %vm294_vm1, %v263_v46  ;;  %v251_v58 = vmax.f32 %v201_v50, 0.0 }
  0xfb   :  { %v203_v53 = vpop.f32.mrf.mxu0  ;;  %1102 = vmatmul.mubr.msk.bf16.vlgmr.msra.gmra.mxu1 %vm294_vm1, %v264_v47 }
  0xfc   :  { %v204_v54 = vadd.f32 %v1418_v33, %v203_v53  ;;  %1118 = vmatpush3.bf16.msra.mxu1 %v1192_v30  ;;  %v254_v55 = vmax.f32 %v212_v51, 0.0  ;;  %v1199_v30 = vld [vmem:[#allocation2] sm:$0xff]  }
  0xfd   :  { %v1091_v56 = vpop.f32.mrf.mxu0  ;;  %1119 = vmatprep.subr.bf16.mxu1 %v1193_v49 }
  0xfe   :  { %v252_v59 = vmax.f32 %v204_v54, 0.0  ;;  %v266_v63 = vpack.c.bf16 %v254_v55, %v253_v60  ;;  %v225_v4 = vadd.f32 %v1091_v56, %v1418_v33 }
  0xff   :  { %v216_v61 = vpop.f32.mrf.mxu0 }
 0x100   :  { %v265_v62 = vpack.c.bf16 %v252_v59, %v251_v58  ;;  %1120 = vmatpush3.bf16.msra.mxu1 %v1193_v49  ;;  %v217_v2 = vadd.f32 %v1418_v33, %v216_v61  ;;  %v257_v12 = vmax.f32 %v225_v4, 0.0 }
 0x101   :  { %v1092_v0 = vpop.f32.mrf.mxu0  ;;  %1121 = vmatprep.subr.bf16.mxu1 %v1194_v57 }
 0x102   :  { %v228_v3 = vadd.f32 %v1092_v0, %v1418_v33  ;;  %1105 = vmatprep.mubr.msk.bf16.mxu1 %vm294_vm1, %v265_v62  ;;  %v255_v10 = vmax.f32 %v217_v2, 0.0 }
 0x103   :  { %v219_v5 = vpop.f32.mrf.mxu0  ;;  %1106 = vmatmul.mubr.msk.bf16.gmra.mxu1 %vm294_vm1, %v266_v63 }
 0x104   :  { %v220_v6 = vadd.f32 %v1418_v33, %v219_v5  ;;  %1122 = vmatpush3.bf16.msra.mxu1 %v1194_v57  ;;  %v258_v7 = vmax.f32 %v228_v3, 0.0 }
 0x105   :  { %v1095_v8 = vpop.f32.mrf.mxu0  ;;  %1123 = vmatprep.subr.bf16.mxu1 %v1195_v1 }
 0x106   :  { %v256_v11 = vmax.f32 %v220_v6, 0.0  ;;  %v268_v15 = vpack.c.bf16 %v258_v7, %v257_v12  ;;  %v241_v19 = vadd.f32 %v1095_v8, %v1418_v33 }
 0x107   :  { %v232_v13 = vpop.f32.mrf.mxu0 }
 0x108   :  { %v267_v14 = vpack.c.bf16 %v256_v11, %v255_v10  ;;  %1124 = vmatpush3.bf16.msra.mxu1 %v1195_v1  ;;  %v233_v17 = vadd.f32 %v1418_v33, %v232_v13  ;;  %v261_v25 = vmax.f32 %v241_v19, 0.0 }
 0x109   :  { %v1096_v16 = vpop.f32.mrf.mxu0  ;;  %1125 = vmatprep.subr.bf16.mxu1 %v1196_v9 }
 0x10a   :  { %v244_v18 = vadd.f32 %v1096_v16, %v1418_v33  ;;  %1109 = vmatprep.mubr.msk.bf16.mxu1 %vm294_vm1, %v267_v14  ;;  %v259_v23 = vmax.f32 %v233_v17, 0.0 }
 0x10b   :  { %v235_v20 = vpop.f32.mrf.mxu0  ;;  %1110 = vmatmul.mubr.msk.bf16.gmra.mxu1 %vm294_vm1, %v268_v15 }
 0x10c   :  { %v236_v21 = vadd.f32 %v1418_v33, %v235_v20  ;;  %1126 = vmatpush3.bf16.msra.mxu1 %v1196_v9  ;;  %v262_v22 = vmax.f32 %v244_v18, 0.0  ;;  %v1202_v33 = vld [vmem:[#allocation5 + $0x28] sm:$0xff]  }
 0x10d   :  { %1127 = vmatprep.subr.bf16.mxu1 %v1197_v28  ;;  %1153 = vmatprep.subr.bf16.mxu0 %v1202_v33 }
 0x10e   :  { %v260_v24 = vmax.f32 %v236_v21, 0.0  ;;  %v270_v27 = vpack.c.bf16 %v262_v22, %v261_v25  ;;  %1154 = vmatpush3.bf16.msra.mxu0 %v1202_v33 }
 0x10f   :  { %1155 = vmatprep.subr.bf16.mxu0 %v1203_v34 }
 0x110   :  { %v269_v26 = vpack.c.bf16 %v260_v24, %v259_v23  ;;  %1128 = vmatpush3.bf16.msra.mxu1 %v1197_v28 }
 0x111   :  { %1129 = vmatprep.subr.bf16.mxu1 %v1198_v29 }
 0x112   :  { %1113 = vmatprep.mubr.msk.bf16.mxu1 %vm294_vm1, %v269_v26  ;;  %1156 = vmatpush3.bf16.msra.mxu0 %v1203_v34  ;;  %v922_v34 = vld [vmem:[%s1465_s6] ss:$0 sm:$0xff] }
 0x113   :  { %1114 = vmatmul.mubr.msk.bf16.gmra.mxu1 %vm294_vm1, %v270_v27  ;;  %1157 = vmatprep.subr.bf16.mxu0 %v1204_v35 }
 0x114   :  { %1130 = vmatpush3.bf16.msra.mxu1 %v1198_v29  ;;  %v1205_v29 = vld [vmem:[#allocation5 + $0x10] sm:$0xff]  }
 0x115   :  { %1131 = vmatprep.subr.bf16.mxu1 %v1199_v30 }
 0x116   :  { %1158 = vmatpush3.bf16.msra.mxu0 %v1204_v35 }
 0x117   :  { %1159 = vmatprep.subr.bf16.mxu0 %v1205_v29 }
 0x118   :  { %1132 = vmatpush3.bf16.msra.mxu1 %v1199_v30  ;;  %v1206_v30 = vld [vmem:[#allocation5 + $0x8] sm:$0xff]  }
 0x11a   :  { %1160 = vmatpush3.bf16.msra.mxu0 %v1205_v29 }
 0x11b   :  { %1161 = vmatprep.subr.bf16.mxu0 %v1206_v30 }
 0x11e   :  { %1162 = vmatpush3.bf16.msra.mxu0 %v1206_v30 }
 0x11f   :  { %1163 = vmatprep.subr.bf16.mxu0 %v1207_v31 }
 0x122   :  { %1164 = vmatpush3.bf16.msra.mxu0 %v1207_v31 }
 0x1bb   :  { %v1103_v36 = vpop.f32.mrf.mxu1 }
 0x1bc   :  { %v362_v42 = vadd.f32 %v1103_v36, %v911_v38 }
 0x1bd   :  { %v353_v37 = vpop.f32.mrf.mxu1 }
 0x1be   :  { %v354_v40 = vadd.f32 %v911_v38, %v353_v37  ;;  %v418_v49 = vmax.f32 %v362_v42, 0.0 }
 0x1bf   :  { %v1104_v39 = vpop.f32.mrf.mxu1 }
 0x1c0   :  { %v365_v41 = vadd.f32 %v1104_v39, %v911_v38  ;;  %v416_v47 = vmax.f32 %v354_v40, 0.0 }
 0x1c1   :  { %v356_v43 = vpop.f32.mrf.mxu1 }
 0x1c2   :  { %v357_v44 = vadd.f32 %v911_v38, %v356_v43  ;;  %v419_v45 = vmax.f32 %v365_v41, 0.0 }
 0x1c3   :  { %v1107_v46 = vpop.f32.mrf.mxu1 }
 0x1c4   :  { %v417_v48 = vmax.f32 %v357_v44, 0.0  ;;  %v433_v52 = vpack.c.bf16 %v419_v45, %v418_v49  ;;  %v378_v56 = vadd.f32 %v1107_v46, %v911_v38 }
 0x1c5   :  { %v369_v50 = vpop.f32.mrf.mxu1 }
 0x1c6   :  { %v432_v51 = vpack.c.bf16 %v417_v48, %v416_v47  ;;  %v370_v54 = vadd.f32 %v911_v38, %v369_v50  ;;  %v422_v63 = vmax.f32 %v378_v56, 0.0 }
 0x1c7   :  { %v1108_v53 = vpop.f32.mrf.mxu1 }
 0x1c8   :  { %v381_v55 = vadd.f32 %v1108_v53, %v911_v38  ;;  %1133 = vmatprep.mubr.bf16.mxu1 %v432_v51  ;;  %v420_v61 = vmax.f32 %v370_v54, 0.0 }
 0x1c9   :  { %v372_v57 = vpop.f32.mrf.mxu1  ;;  %1134 = vmatmul.mubr.bf16.vlgmr.msra.gmra.mxu1 %v433_v52 }
 0x1ca   :  { %v373_v58 = vadd.f32 %v911_v38, %v372_v57  ;;  %v423_v59 = vmax.f32 %v381_v55, 0.0 }
 0x1cb   :  { %v1111_v60 = vpop.f32.mrf.mxu1 }
 0x1cc   :  { %v421_v62 = vmax.f32 %v373_v58, 0.0  ;;  %v435_v2 = vpack.c.bf16 %v423_v59, %v422_v63  ;;  %v394_v6 = vadd.f32 %v1111_v60, %v911_v38 }
 0x1cd   :  { %v385_v0 = vpop.f32.mrf.mxu1 }
 0x1ce   :  { %v434_v1 = vpack.c.bf16 %v421_v62, %v420_v61  ;;  %v386_v4 = vadd.f32 %v911_v38, %v385_v0  ;;  %v426_v13 = vmax.f32 %v394_v6, 0.0 }
 0x1cf   :  { %v1112_v3 = vpop.f32.mrf.mxu1 }
 0x1d0   :  { %v397_v5 = vadd.f32 %v1112_v3, %v911_v38  ;;  %1137 = vmatprep.mubr.bf16.mxu1 %v434_v1  ;;  %v424_v11 = vmax.f32 %v386_v4, 0.0 }
 0x1d1   :  { %v388_v7 = vpop.f32.mrf.mxu1  ;;  %1138 = vmatmul.mubr.bf16.gmra.mxu1 %v435_v2 }
 0x1d2   :  { %v389_v8 = vadd.f32 %v911_v38, %v388_v7  ;;  %v427_v9 = vmax.f32 %v397_v5, 0.0 }
 0x1d3   :  { %v1115_v10 = vpop.f32.mrf.mxu1 }
 0x1d4   :  { %v425_v12 = vmax.f32 %v389_v8, 0.0  ;;  %v437_v16 = vpack.c.bf16 %v427_v9, %v426_v13  ;;  %v410_v20 = vadd.f32 %v1115_v10, %v911_v38 }
 0x1d5   :  { %v401_v14 = vpop.f32.mrf.mxu1 }
 0x1d6   :  { %v436_v15 = vpack.c.bf16 %v425_v12, %v424_v11  ;;  %v402_v18 = vadd.f32 %v911_v38, %v401_v14  ;;  %v430_v26 = vmax.f32 %v410_v20, 0.0 }
 0x1d7   :  { %v1116_v17 = vpop.f32.mrf.mxu1 }
 0x1d8   :  { %v413_v19 = vadd.f32 %v1116_v17, %v911_v38  ;;  %1141 = vmatprep.mubr.bf16.mxu1 %v436_v15  ;;  %v428_v24 = vmax.f32 %v402_v18, 0.0 }
 0x1d9   :  { %v404_v21 = vpop.f32.mrf.mxu1  ;;  %1142 = vmatmul.mubr.bf16.gmra.mxu1 %v437_v16 }
 0x1da   :  { %v405_v22 = vadd.f32 %v911_v38, %v404_v21  ;;  %v431_v23 = vmax.f32 %v413_v19, 0.0 }
 0x1dc   :  { %v429_v25 = vmax.f32 %v405_v22, 0.0  ;;  %v439_v28 = vpack.c.bf16 %v431_v23, %v430_v26  ;;  %v931_v26 = vld [vmem:[%s1467_s8] ss:$0 sm:$0xff] }
 0x1de   :  { %v438_v27 = vpack.c.bf16 %v429_v25, %v428_v24 }
 0x1e0   :  { %1145 = vmatprep.mubr.bf16.mxu1 %v438_v27 }
 0x1e1   :  { %1146 = vmatmul.mubr.bf16.gmra.mxu1 %v439_v28 }
 0x289   :  { %v1135_v32 = vpop.f32.mrf.mxu1 }
 0x28a   :  { %v554_v38 = vadd.f32 %v1135_v32, %v922_v34 }
 0x28b   :  { %v545_v33 = vpop.f32.mrf.mxu1 }
 0x28c   :  { %v546_v36 = vadd.f32 %v922_v34, %v545_v33  ;;  %v610_v45 = vmax.f32 %v554_v38, 0.0 }
 0x28d   :  { %v1136_v35 = vpop.f32.mrf.mxu1 }
 0x28e   :  { %v557_v37 = vadd.f32 %v1136_v35, %v922_v34  ;;  %v608_v43 = vmax.f32 %v546_v36, 0.0 }
 0x28f   :  { %v548_v39 = vpop.f32.mrf.mxu1 }
 0x290   :  { %v549_v40 = vadd.f32 %v922_v34, %v548_v39  ;;  %v611_v41 = vmax.f32 %v557_v37, 0.0 }
 0x291   :  { %v1139_v42 = vpop.f32.mrf.mxu1 }
 0x292   :  { %v609_v44 = vmax.f32 %v549_v40, 0.0  ;;  %v625_v48 = vpack.c.bf16 %v611_v41, %v610_v45  ;;  %v570_v52 = vadd.f32 %v1139_v42, %v922_v34 }
 0x293   :  { %v561_v46 = vpop.f32.mrf.mxu1 }
 0x294   :  { %v624_v47 = vpack.c.bf16 %v609_v44, %v608_v43  ;;  %v562_v50 = vadd.f32 %v922_v34, %v561_v46  ;;  %v614_v59 = vmax.f32 %v570_v52, 0.0 }
 0x295   :  { %v1140_v49 = vpop.f32.mrf.mxu1 }
 0x296   :  { %v573_v51 = vadd.f32 %v1140_v49, %v922_v34  ;;  %1165 = vmatprep.mubr.bf16.mxu0 %v624_v47  ;;  %v612_v57 = vmax.f32 %v562_v50, 0.0 }
 0x297   :  { %v564_v53 = vpop.f32.mrf.mxu1  ;;  %1166 = vmatmul.mubr.bf16.vlgmr.msra.gmra.mxu0 %v625_v48 }
 0x298   :  { %v565_v54 = vadd.f32 %v922_v34, %v564_v53  ;;  %v615_v55 = vmax.f32 %v573_v51, 0.0 }
 0x299   :  { %v1143_v56 = vpop.f32.mrf.mxu1 }
 0x29a   :  { %v613_v58 = vmax.f32 %v565_v54, 0.0  ;;  %v627_v62 = vpack.c.bf16 %v615_v55, %v614_v59  ;;  %v586_v2 = vadd.f32 %v1143_v56, %v922_v34 }
 0x29b   :  { %v577_v60 = vpop.f32.mrf.mxu1 }
 0x29c   :  { %v626_v61 = vpack.c.bf16 %v613_v58, %v612_v57  ;;  %v578_v0 = vadd.f32 %v922_v34, %v577_v60  ;;  %v618_v9 = vmax.f32 %v586_v2, 0.0 }
 0x29d   :  { %v1144_v63 = vpop.f32.mrf.mxu1 }
 0x29e   :  { %v589_v1 = vadd.f32 %v1144_v63, %v922_v34  ;;  %1169 = vmatprep.mubr.bf16.mxu0 %v626_v61  ;;  %v616_v7 = vmax.f32 %v578_v0, 0.0 }
 0x29f   :  { %v580_v3 = vpop.f32.mrf.mxu1  ;;  %1170 = vmatmul.mubr.bf16.gmra.mxu0 %v627_v62 }
 0x2a0   :  { %v581_v4 = vadd.f32 %v922_v34, %v580_v3  ;;  %v619_v5 = vmax.f32 %v589_v1, 0.0 }
 0x2a1   :  { %v1147_v6 = vpop.f32.mrf.mxu1 }
 0x2a2   :  { %v617_v8 = vmax.f32 %v581_v4, 0.0  ;;  %v629_v12 = vpack.c.bf16 %v619_v5, %v618_v9  ;;  %v602_v16 = vadd.f32 %v1147_v6, %v922_v34 }
 0x2a3   :  { %v593_v10 = vpop.f32.mrf.mxu1 }
 0x2a4   :  { %v628_v11 = vpack.c.bf16 %v617_v8, %v616_v7  ;;  %v594_v14 = vadd.f32 %v922_v34, %v593_v10  ;;  %v622_v22 = vmax.f32 %v602_v16, 0.0 }
 0x2a5   :  { %v1148_v13 = vpop.f32.mrf.mxu1 }
 0x2a6   :  { %v605_v15 = vadd.f32 %v1148_v13, %v922_v34  ;;  %1173 = vmatprep.mubr.bf16.mxu0 %v628_v11  ;;  %v620_v20 = vmax.f32 %v594_v14, 0.0 }
 0x2a7   :  { %v596_v17 = vpop.f32.mrf.mxu1  ;;  %1174 = vmatmul.mubr.bf16.gmra.mxu0 %v629_v12 }
 0x2a8   :  { %v597_v18 = vadd.f32 %v922_v34, %v596_v17  ;;  %v623_v19 = vmax.f32 %v605_v15, 0.0 }
 0x2aa   :  { %v621_v21 = vmax.f32 %v597_v18, 0.0  ;;  %v631_v24 = vpack.c.bf16 %v623_v19, %v622_v22 }
 0x2ac   :  { %v630_v23 = vpack.c.bf16 %v621_v21, %v620_v20 }
 0x2ae   :  { %1177 = vmatprep.mubr.bf16.mxu0 %v630_v23 }
 0x2af   :  { %1178 = vmatmul.mubr.bf16.gmra.mxu0 %v631_v24 }
 0x357   :  { %v1167_v25 = vpop.f32.mrf.mxu0 }
 0x358   :  { %v746_v29 = vadd.f32 %v1167_v25, %v931_v26 }
 0x359   :  { %v737_v27 = vpop.f32.mrf.mxu0 }
 0x35a   :  { %v738_v32 = vadd.f32 %v931_v26, %v737_v27 }
 0x35b   :  { %v1168_v28 = vpop.f32.mrf.mxu0 }
 0x35c   :  { %v749_v30 = vadd.f32 %v1168_v28, %v931_v26 }
 0x35d   :  { %v740_v31 = vpop.f32.mrf.mxu0 }
 0x35e   :  { %v980_v33 = vpack.c.bf16 %v749_v30, %v746_v29  ;;  %v741_v34 = vadd.f32 %v931_v26, %v740_v31 }
 0x35f   :  { %v1171_v35 = vpop.f32.mrf.mxu0 }
 0x360   :  { %1012 = vst [vmem:[#allocation7 + $0x8] sm:$0xff] %v980_v33   ;;  %v975_v36 = vpack.c.bf16 %v741_v34, %v738_v32  ;;  %v762_v39 = vadd.f32 %v1171_v35, %v931_v26 }
 0x361   :  { %v753_v37 = vpop.f32.mrf.mxu0 }
 0x362   :  { %976 = vst [vmem:[#allocation7] sm:$0xff] %v975_v36   ;;  %v754_v42 = vadd.f32 %v931_v26, %v753_v37 }
 0x363   :  { %v1172_v38 = vpop.f32.mrf.mxu0 }
 0x364   :  { %v765_v40 = vadd.f32 %v1172_v38, %v931_v26 }
 0x365   :  { %v756_v41 = vpop.f32.mrf.mxu0 }
 0x366   :  { %v990_v43 = vpack.c.bf16 %v765_v40, %v762_v39  ;;  %v757_v44 = vadd.f32 %v931_v26, %v756_v41 }
 0x367   :  { %v1175_v45 = vpop.f32.mrf.mxu0 }
 0x368   :  { %1014 = vst [vmem:[#allocation7 + $0x18] sm:$0xff] %v990_v43   ;;  %v985_v46 = vpack.c.bf16 %v757_v44, %v754_v42  ;;  %v778_v49 = vadd.f32 %v1175_v45, %v931_v26 }
 0x369   :  { %v769_v47 = vpop.f32.mrf.mxu0 }
 0x36a   :  { %1013 = vst [vmem:[#allocation7 + $0x10] sm:$0xff] %v985_v46   ;;  %v770_v52 = vadd.f32 %v931_v26, %v769_v47 }
 0x36b   :  { %v1176_v48 = vpop.f32.mrf.mxu0 }
 0x36c   :  { %v781_v50 = vadd.f32 %v1176_v48, %v931_v26 }
 0x36d   :  { %v772_v51 = vpop.f32.mrf.mxu0 }
 0x36e   :  { %v1000_v53 = vpack.c.bf16 %v781_v50, %v778_v49  ;;  %v773_v54 = vadd.f32 %v931_v26, %v772_v51 }
 0x36f   :  { %v1179_v55 = vpop.f32.mrf.mxu0 }
 0x370   :  { %1016 = vst [vmem:[#allocation7 + $0x28] sm:$0xff] %v1000_v53   ;;  %v995_v56 = vpack.c.bf16 %v773_v54, %v770_v52  ;;  %v794_v59 = vadd.f32 %v1179_v55, %v931_v26 }
 0x371   :  { %v785_v57 = vpop.f32.mrf.mxu0 }
 0x372   :  { %1015 = vst [vmem:[#allocation7 + $0x20] sm:$0xff] %v995_v56   ;;  %v786_v62 = vadd.f32 %v931_v26, %v785_v57 }
 0x373   :  { %v1180_v58 = vpop.f32.mrf.mxu0 }
 0x374   :  { %v797_v60 = vadd.f32 %v1180_v58, %v931_v26 }
 0x375   :  { %v788_v61 = vpop.f32.mrf.mxu0 }
 0x376   :  { %v1010_v63 = vpack.c.bf16 %v797_v60, %v794_v59  ;;  %v789_v0 = vadd.f32 %v931_v26, %v788_v61 }
 0x378   :  { %1018 = vst [vmem:[#allocation7 + $0x38] sm:$0xff] %v1010_v63   ;;  %v1005_v1 = vpack.c.bf16 %v789_v0, %v786_v62 }
 0x37a   :  { %1017 = vst [vmem:[#allocation7 + $0x30] sm:$0xff] %v1005_v1  }
 0x37b   :  { %884 = vsyncadd [#allocation4], 896  ;;  %s1278_s8 = smov [#allocation7]  }
 0x37c   :  { %s885_s23 = sshll.u32 %s1278_s8, 4  ;;  %s886_s23 = int_to_ptr.vmem [resolvable:$true] %s885_s23 }
 0x37d   :  { %s1248_s24 = scalar_lea.vmem %s886_s23, 128  ;;  %s1252_s25 = scalar_lea.vmem %s886_s23, 1024 }
 0x37e   :  { %p1249_p10 = scmp.ne.s32.totalorder %s886_s23, %s1248_s24  ;;  %p1253_p11 = scmp.lt.s32.totalorder %s886_s23, %s886_s23 }
 0x37f   :  { %p1254_p12 = scmp.lt.s32.totalorder %s1252_s25, %s1248_s24 }
 0x381   :  { %p1255_p13 = por %p1254_p12, %p1253_p11 }
 0x383   :  { %p1256_p0 = pnand %p1255_p13, %p1249_p10 }
 0x385   :  { %1259 = shalt.err (!%p1256_p0)
}
 0x386   :  { %891 = dma.vmem_to_hbm [thread:$0]  %s886_s23, 128, %s1468_s9, [#allocation4], %s1275_s12, %s1275_s12, %s1276_s13  }
 0x387   :  { %1272 = dma.done.wait [#allocation4], 1024  }
 0x388   :  { %1273 = vsyncadd [#allocation4], 4294966272 }
 0x389   :  { %895 = vsyncpa [#allocation3], 1 }
 0x38a   :  { %896 = vsyncpa [#allocation6], 1 }
 0x38b   :  { %897 = vsyncpa [#allocation4], 1 }

</bundles_post_ra>
